<compile_context>
chip_gen: v7x
topology: tpu7x:2x2x1
jax: 0.10.0
libtpu: 0.0.40
codegen_flags: <defaults>
</compile_context>

<pallas_src>
import math
from functools import partial

import numpy as np
import jax
import jax.numpy as jnp
from jax.experimental import pallas as pl
from jax.experimental.pallas import tpu as pltpu


def _round_up(x, m):
    return ((x + m - 1) // m) * m


def _cdiv(a, b):
    return -(-a // b)


# ----------------------------- Pallas kernels --------------------------------

def _fused_fourier_mlp_kernel(freqs, x_ref, w1x_ref, w1s_ref, w1c_ref, b1_ref,
                              w2_ref, b2_ref, w3_ref, b3_ref, o_ref):
    """Fused Fourier-feature + 3-layer MLP on 4-row-packed tiles.

    freqs: tuple of Python floats (baked compile-time constants, exact f32 round-trip).
    x_ref: (tm, P*D) -- P logical rows packed per physical row.
    Weights are block-diagonal (built host-side), so the three layer-1 dots sum to
    exactly concat(x, sin, cos) @ W1 per packed slot with the reference (f*D + d) order.
    """
    xv = x_ref[...]                                                   # (tm, P*D) f32
    # One angle slab for all packed slots & modes: column (f, p, d) = x_p[d] * freqs[f].
    ang = jnp.concatenate([xv * f for f in freqs], axis=-1)           # (tm, Fm*P*D)
    h = jnp.dot(xv, w1x_ref[...], preferred_element_type=jnp.float32)
    h = h + jnp.dot(jnp.sin(ang), w1s_ref[...], preferred_element_type=jnp.float32)
    h = h + jnp.dot(jnp.cos(ang), w1c_ref[...], preferred_element_type=jnp.float32)
    h = jnp.maximum(h + b1_ref[...], 0.0)                             # relu(fc1)
    h = jnp.maximum(jnp.dot(h, w2_ref[...], preferred_element_type=jnp.float32)
                    + b2_ref[...], 0.0)                               # relu(fc2)
    h = jnp.dot(h, w3_ref[...], preferred_element_type=jnp.float32) + b3_ref[...]
    o_ref[...] = h.astype(o_ref.dtype)


def _plain_mlp_kernel(x_ref, w1_ref, b1_ref, w2_ref, b2_ref, w3_ref, b3_ref, o_ref):
    """3-layer MLP on already-built (packed) features (fourier_features=False path)."""
    h = jnp.dot(x_ref[...], w1_ref[...], preferred_element_type=jnp.float32) + b1_ref[...]
    h = jnp.maximum(h, 0.0)
    h = jnp.maximum(jnp.dot(h, w2_ref[...], preferred_element_type=jnp.float32) + b2_ref[...], 0.0)
    h = jnp.dot(h, w3_ref[...], preferred_element_type=jnp.float32) + b3_ref[...]
    o_ref[...] = h.astype(o_ref.dtype)


# --------------------------- host-side packing helpers ------------------------

def _choose_pack(h_out, target_lanes=128):
    """Pack factor P so the output tile is ~lane-dense (P*h_out ~ 128)."""
    if h_out >= target_lanes:
        return 1
    return max(1, target_lanes // h_out)


def _blockdiag(w, P):
    """(din, dout) -> (P*din, P*dout) block-diagonal (kron(eye(P), w))."""
    din, dout = w.shape
    eye_p = jnp.eye(P, dtype=w.dtype)
    return (eye_p[:, None, :, None] * w[None, :, None, :]).reshape(P * din, P * dout)


def _pack_fourier_w(w_slab, P, Fm, D, H):
    """Pack the sin (or cos) slice of W1 to match the in-kernel angle-slab ordering.

    w_slab: (Fm*D, H) with rows indexed f*D + d (reference ordering).
    Returns (Fm*P*D, P*H) where row (f, p, d) feeds output columns [p*H, (p+1)*H).
    """
    w_f = w_slab.reshape(Fm, D, H)
    eye_p = jnp.eye(P, dtype=w_slab.dtype)
    packed = eye_p[None, :, None, :, None] * w_f[:, None, :, None, :]   # (Fm, P, D, P, H)
    return packed.reshape(Fm * P * D, P * H)


def _choose_tile(rows, tm_rows_max, min_steps=2):
    """Pick a physical-row tile (multiple of 8).

    Keeps >= min_steps grid steps (v7x: 2 TensorCores only both get work with >= 2
    "parallel" steps) and keeps padding waste to < 8*steps rows instead of padding up
    to a full max-size tile.
    """
    rows = max(rows, 1)
    steps = max(min_steps, _cdiv(rows, tm_rows_max))
    tm = max(8, _round_up(_cdiv(rows, steps), 8))
    tm = min(tm, max(tm_rows_max, 8))
    rows_pad = _round_up(rows, tm)
    return tm, rows_pad


def _pack_rows(x2d, P):
    """(M, F) -> padded, row-packed (ceil(M/P), P*F)."""
    M, F = x2d.shape
    Mp = _round_up(M, P)
    if Mp != M:
        x2d = jnp.pad(x2d, ((0, Mp - M), (0, 0)))
    return x2d.reshape(Mp // P, P * F), Mp


# ----------------------------- pallas_call wrappers ---------------------------

def _run_fused(x2d, freqs_np, w1, b1, w2, b2, w3, b3, *, tm_logical=8192, min_grid_steps=2):
    """x2d: (M, D) f32 raw parameters. Fourier features are built inside the kernel."""
    M, D = x2d.shape
    Fm = int(freqs_np.shape[0])
    H1, H2, H3 = w1.shape[1], w2.shape[1], w3.shape[1]
    assert w1.shape[0] == D + 2 * D * Fm

    P = _choose_pack(H3)

    # One-time weight packing (block-diagonal so P logical rows share a physical row).
    # In production pack once and reuse across calls; it is cheap vs. large-M forwards.
    w1x_p = _blockdiag(w1[:D], P)                                     # (P*D, P*H1)
    w1s_p = _pack_fourier_w(w1[D:D + D * Fm], P, Fm, D, H1)           # (Fm*P*D, P*H1)
    w1c_p = _pack_fourier_w(w1[D + D * Fm:], P, Fm, D, H1)            # (Fm*P*D, P*H1)
    b1_p = jnp.tile(b1, (1, P))
    w2_p = _blockdiag(w2, P)
    b2_p = jnp.tile(b2, (1, P))
    w3_p = _blockdiag(w3, P)
    b3_p = jnp.tile(b3, (1, P))

    xp, Mp = _pack_rows(x2d, P)
    rows = Mp // P
    tm_rows, rows_pad = _choose_tile(rows, max(tm_logical // P, 8), min_grid_steps)
    if rows_pad != rows:
        xp = jnp.pad(xp, ((0, rows_pad - rows), (0, 0)))

    full = lambda i: (0, 0)
    kernel = partial(_fused_fourier_mlp_kernel,
                     tuple(float(f) for f in np.asarray(freqs_np, dtype=np.float32)))

    out = pl.pallas_call(
        kernel,
        out_shape=jax.ShapeDtypeStruct((rows_pad, P * H3), jnp.float32),
        grid_spec=pltpu.PrefetchScalarGridSpec(
            num_scalar_prefetch=0,
            grid=(rows_pad // tm_rows,),
            in_specs=[
                pl.BlockSpec((tm_rows, P * D), lambda i: (i, 0)),     # raw packed x rows
                pl.BlockSpec((P * D, P * H1), full),                  # W1_x  (VMEM-resident)
                pl.BlockSpec((Fm * P * D, P * H1), full),             # W1_sin
                pl.BlockSpec((Fm * P * D, P * H1), full),             # W1_cos
                pl.BlockSpec((1, P * H1), full),                      # b1
                pl.BlockSpec((P * H1, P * H2), full),                 # W2
                pl.BlockSpec((1, P * H2), full),                      # b2
                pl.BlockSpec((P * H2, P * H3), full),                 # W3
                pl.BlockSpec((1, P * H3), full),                      # b3
            ],
            out_specs=pl.BlockSpec((tm_rows, P * H3), lambda i: (i, 0)),
        ),
        compiler_params=pltpu.CompilerParams(dimension_semantics=("parallel",)),
    )(xp, w1x_p, w1s_p, w1c_p, b1_p, w2_p, b2_p, w3_p, b3_p)

    out = out[:rows].reshape(Mp, H3)                                  # unpack: free reshape
    return out[:M] if Mp != M else out


def _run_plain(x2d, w1, b1, w2, b2, w3, b3, *, tm_logical=8192, min_grid_steps=2):
    """x2d: (M, F_in) f32 features fed directly to fc1 (fourier_features=False)."""
    M, F_in = x2d.shape
    H1, H2, H3 = w1.shape[1], w2.shape[1], w3.shape[1]
    assert w1.shape[0] == F_in

    P = _choose_pack(H3)
    w1_p = _blockdiag(w1, P)
    b1_p = jnp.tile(b1, (1, P))
    w2_p = _blockdiag(w2, P)
    b2_p = jnp.tile(b2, (1, P))
    w3_p = _blockdiag(w3, P)
    b3_p = jnp.tile(b3, (1, P))

    xp, Mp = _pack_rows(x2d, P)
    rows = Mp // P
    tm_rows, rows_pad = _choose_tile(rows, max(tm_logical // P, 8), min_grid_steps)
    if rows_pad != rows:
        xp = jnp.pad(xp, ((0, rows_pad - rows), (0, 0)))

    full = lambda i: (0, 0)
    out = pl.pallas_call(
        _plain_mlp_kernel,
        out_shape=jax.ShapeDtypeStruct((rows_pad, P * H3), jnp.float32),
        grid_spec=pltpu.PrefetchScalarGridSpec(
            num_scalar_prefetch=0,
            grid=(rows_pad // tm_rows,),
            in_specs=[
                pl.BlockSpec((tm_rows, P * F_in), lambda i: (i, 0)),
                pl.BlockSpec((P * F_in, P * H1), full),
                pl.BlockSpec((1, P * H1), full),
                pl.BlockSpec((P * H1, P * H2), full),
                pl.BlockSpec((1, P * H2), full),
                pl.BlockSpec((P * H2, P * H3), full),
                pl.BlockSpec((1, P * H3), full),
            ],
            out_specs=pl.BlockSpec((tm_rows, P * H3), lambda i: (i, 0)),
        ),
        compiler_params=pltpu.CompilerParams(dimension_semantics=("parallel",)),
    )(xp, w1_p, b1_p, w2_p, b2_p, w3_p, b3_p)

    out = out[:rows].reshape(Mp, H3)
    return out[:M] if Mp != M else out


# --------------------------- JAX-side glue / reference ------------------------

def fourier_encode_vectorized(coords, freqs):
    """Matches the PyTorch reference: frequency-major flatten (index = f*D + d),
    then [sin, cos] concatenated on the last axis -> (..., 2*D*F)."""
    freqs = jnp.asarray(freqs)
    D = coords.shape[-1]
    Fm = freqs.shape[0]
    scaled = coords[..., None, :] * freqs[None, :, None]              # (..., F, D)
    scaled = scaled.reshape(*coords.shape[:-1], D * Fm)
    return jnp.concatenate([jnp.sin(scaled), jnp.cos(scaled)], axis=-1)


def parameter_model_forward(x, weights, freqs, *, fourier_features=True,
                            tm_logical=8192, min_grid_steps=2):
    """x: (..., input_features) f32. Returns (..., base_layer).
    `freqs` is the deterministic buffer exp(linspace(0, pi, num_modes))."""
    lead = x.shape[:-1]
    x2d = x.reshape(-1, x.shape[-1]).astype(jnp.float32)
    w1, b1, w2, b2, w3, b3 = weights
    if fourier_features:
        out = _run_fused(x2d, np.asarray(freqs, dtype=np.float32),
                         w1, b1, w2, b2, w3, b3,
                         tm_logical=tm_logical, min_grid_steps=min_grid_steps)
    else:
        out = _run_plain(x2d, w1, b1, w2, b2, w3, b3,
                         tm_logical=tm_logical, min_grid_steps=min_grid_steps)
    return out.reshape(*lead, out.shape[-1])


def init_params(key, input_features, num_modes, base_layer, fourier_features=True):
    """Deterministic nn.Linear-style init: U(-1/sqrt(fan_in), 1/sqrt(fan_in)).
    Weights stored transposed w.r.t. PyTorch, i.e. (fan_in, fan_out)."""
    if fourier_features:
        f_in = input_features + input_features * num_modes * 2
    else:
        f_in = input_features
    dims = [(f_in, base_layer), (base_layer, base_layer), (base_layer, base_layer)]
    weights = []
    for (din, dout) in dims:
        key, kw, kb = jax.random.split(key, 3)
        bound = 1.0 / math.sqrt(din)
        w = jax.random.uniform(kw, (din, dout), jnp.float32, -bound, bound)
        b = jax.random.uniform(kb, (1, dout), jnp.float32, -bound, bound)
        weights += [w, b]
    # Registered buffer in the PyTorch module; deterministic from config, kept as f32.
    freqs = np.exp(np.linspace(0.0, math.pi, num_modes)).astype(np.float32)
    return tuple(weights), freqs


def reference_forward(x, weights, freqs, fourier_features=True):
    """Pure-JAX reference mirroring the PyTorch forward."""
    if fourier_features:
        params = jnp.concatenate((x, fourier_encode_vectorized(x, freqs)), axis=-1)
    else:
        params = x
    w1, b1, w2, b2, w3, b3 = weights
    h = jax.nn.relu(params @ w1 + b1[0])
    h = jax.nn.relu(h @ w2 + b2[0])
    return h @ w3 + b3[0]


# --------------------------------- main --------------------------------------

if __name__ == "__main__":
    input_features = 2        # e.g. inlet velocity, air density
    num_modes = 5
    base_layer = 32

    # Fourier-feature path (module default)
    weights, freqs = init_params(jax.random.PRNGKey(0), input_features, num_modes,
                                 base_layer, fourier_features=True)
    x = jax.random.normal(jax.random.PRNGKey(0), (2, 8, input_features), jnp.float32)
    out = jax.block_until_ready(parameter_model_forward(x, weights, freqs, fourier_features=True))
    ref = reference_forward(x, weights, freqs, fourier_features=True)
    assert out.shape == (2, 8, base_layer)
    assert jnp.allclose(out, ref, atol=1e-4, rtol=1e-4), "fused kernel mismatch vs reference"

    # Ragged row count (M=15, not a multiple of the 4-row pack) -> exercises padding paths.
    x2 = jax.random.normal(jax.random.PRNGKey(1), (3, 5, input_features), jnp.float32)
    out2 = jax.block_until_ready(parameter_model_forward(x2, weights, freqs, fourier_features=True))
    ref2 = reference_forward(x2, weights, freqs, fourier_features=True)
    assert jnp.allclose(out2, ref2, atol=1e-4, rtol=1e-4), "padded-path mismatch vs reference"

    # Larger M -> multi-step "parallel" grid (>= 2 steps so v7x's 2 TensorCores share work).
    x3 = jax.random.normal(jax.random.PRNGKey(3), (1, 4100, input_features), jnp.float32)
    out3 = jax.block_until_ready(parameter_model_forward(x3, weights, freqs, fourier_features=True))
    ref3 = reference_forward(x3, weights, freqs, fourier_features=True)
    assert jnp.allclose(out3, ref3, atol=1e-4, rtol=1e-4), "multi-tile mismatch vs reference"

    # fourier_features=False path
    weights_p, _ = init_params(jax.random.PRNGKey(2), input_features, num_modes,
                               base_layer, fourier_features=False)
    out4 = jax.block_until_ready(parameter_model_forward(x, weights_p, freqs, fourier_features=False))
    ref4 = reference_forward(x, weights_p, freqs, fourier_features=False)
    assert jnp.allclose(out4, ref4, atol=1e-4, rtol=1e-4), "plain-path mismatch vs reference"

    print("KERNEL_OK")
</pallas_src>

<mosaic_0001>
module attributes {stable_mosaic.version = 11 : i64} {
  func.func @_fused_fourier_mlp_kernel(%arg0: i32, %arg1: memref<8x8xf32, #tpu.memory_space<vmem>>, %arg2: memref<8x128xf32, #tpu.memory_space<vmem>>, %arg3: memref<40x128xf32, #tpu.memory_space<vmem>>, %arg4: memref<40x128xf32, #tpu.memory_space<vmem>>, %arg5: memref<1x128xf32, #tpu.memory_space<vmem>>, %arg6: memref<128x128xf32, #tpu.memory_space<vmem>>, %arg7: memref<1x128xf32, #tpu.memory_space<vmem>>, %arg8: memref<128x128xf32, #tpu.memory_space<vmem>>, %arg9: memref<1x128xf32, #tpu.memory_space<vmem>>, %arg10: memref<8x128xf32, #tpu.memory_space<vmem>>) attributes {dimension_semantics = [#tpu.dimension_semantics<parallel>], iteration_bounds = array<i64: 1>, scalar_prefetch = 0 : i64, scratch_operands = 0 : i64, tpu.core_type = #tpu.core_type<tc>, window_params = [{transform_indices = @transform_0, window_bounds = array<i64: 8, 8>}, {pipeline_mode = #tpu.pipeline_mode<synchronous>, transform_indices = @transform_1, window_bounds = array<i64: 8, 128>}, {pipeline_mode = #tpu.pipeline_mode<synchronous>, transform_indices = @transform_2, window_bounds = array<i64: 40, 128>}, {pipeline_mode = #tpu.pipeline_mode<synchronous>, transform_indices = @transform_3, window_bounds = array<i64: 40, 128>}, {pipeline_mode = #tpu.pipeline_mode<synchronous>, transform_indices = @transform_4, window_bounds = array<i64: 1, 128>}, {pipeline_mode = #tpu.pipeline_mode<synchronous>, transform_indices = @transform_5, window_bounds = array<i64: 128, 128>}, {pipeline_mode = #tpu.pipeline_mode<synchronous>, transform_indices = @transform_6, window_bounds = array<i64: 1, 128>}, {pipeline_mode = #tpu.pipeline_mode<synchronous>, transform_indices = @transform_7, window_bounds = array<i64: 128, 128>}, {pipeline_mode = #tpu.pipeline_mode<synchronous>, transform_indices = @transform_8, window_bounds = array<i64: 1, 128>}, {transform_indices = @transform_9, window_bounds = array<i64: 8, 128>}]} {
    %c0 = arith.constant 0 : index
    %c0_0 = arith.constant 0 : index
    %0 = vector.load %arg1[%c0, %c0_0] : memref<8x8xf32, #tpu.memory_space<vmem>>, vector<8x8xf32>
    %cst = arith.constant 1.000000e+00 : f32
    %1 = vector.broadcast %cst : f32 to vector<8x8xf32>
    %2 = arith.mulf %0, %1 : vector<8x8xf32>
    %cst_1 = arith.constant 2.193280e+00 : f32
    %3 = vector.broadcast %cst_1 : f32 to vector<8x8xf32>
    %4 = arith.mulf %0, %3 : vector<8x8xf32>
    %cst_2 = arith.constant 4.81047726 : f32
    %5 = vector.broadcast %cst_2 : f32 to vector<8x8xf32>
    %6 = arith.mulf %0, %5 : vector<8x8xf32>
    %cst_3 = arith.constant 10.550724 : f32
    %7 = vector.broadcast %cst_3 : f32 to vector<8x8xf32>
    %8 = arith.mulf %0, %7 : vector<8x8xf32>
    %cst_4 = arith.constant 23.1406918 : f32
    %9 = vector.broadcast %cst_4 : f32 to vector<8x8xf32>
    %10 = arith.mulf %0, %9 : vector<8x8xf32>
    %11 = tpu.concatenate %2, %4, %6, %8, %10 in 1 : vector<8x8xf32>, vector<8x8xf32>, vector<8x8xf32>, vector<8x8xf32>, vector<8x8xf32> -> vector<8x40xf32>
    %c0_5 = arith.constant 0 : index
    %c0_6 = arith.constant 0 : index
    %12 = vector.load %arg2[%c0_5, %c0_6] : memref<8x128xf32, #tpu.memory_space<vmem>>, vector<8x128xf32>
    %cst_7 = arith.constant dense<0.000000e+00> : vector<8x128xf32>
    %13 = tpu.matmul %0, %12, %cst_7 {dimension_numbers = #tpu.dot_dimension_numbers<[1], [0], [0], [1], [0, 0, 1, 1], [], []>} : vector<8x8xf32>, vector<8x128xf32>, vector<8x128xf32> -> vector<8x128xf32>
    %14 = math.sin %11 : vector<8x40xf32>
    %c0_8 = arith.constant 0 : index
    %c0_9 = arith.constant 0 : index
    %15 = vector.load %arg3[%c0_8, %c0_9] : memref<40x128xf32, #tpu.memory_space<vmem>>, vector<40x128xf32>
    %cst_10 = arith.constant dense<0.000000e+00> : vector<8x128xf32>
    %16 = tpu.matmul %14, %15, %cst_10 {dimension_numbers = #tpu.dot_dimension_numbers<[1], [0], [0], [1], [0, 0, 1, 1], [], []>} : vector<8x40xf32>, vector<40x128xf32>, vector<8x128xf32> -> vector<8x128xf32>
    %17 = arith.addf %13, %16 : vector<8x128xf32>
    %18 = math.cos %11 : vector<8x40xf32>
    %c0_11 = arith.constant 0 : index
    %c0_12 = arith.constant 0 : index
    %19 = vector.load %arg4[%c0_11, %c0_12] : memref<40x128xf32, #tpu.memory_space<vmem>>, vector<40x128xf32>
    %cst_13 = arith.constant dense<0.000000e+00> : vector<8x128xf32>
    %20 = tpu.matmul %18, %19, %cst_13 {dimension_numbers = #tpu.dot_dimension_numbers<[1], [0], [0], [1], [0, 0, 1, 1], [], []>} : vector<8x40xf32>, vector<40x128xf32>, vector<8x128xf32> -> vector<8x128xf32>
    %21 = arith.addf %17, %20 : vector<8x128xf32>
    %c0_14 = arith.constant 0 : index
    %c0_15 = arith.constant 0 : index
    %22 = vector.load %arg5[%c0_14, %c0_15] : memref<1x128xf32, #tpu.memory_space<vmem>>, vector<1x128xf32>
    %23 = vector.broadcast %22 : vector<1x128xf32> to vector<8x128xf32>
    %24 = arith.addf %21, %23 : vector<8x128xf32>
    %cst_16 = arith.constant 0.000000e+00 : f32
    %25 = vector.broadcast %cst_16 : f32 to vector<8x128xf32>
    %26 = arith.maximumf %24, %25 : vector<8x128xf32>
    %c0_17 = arith.constant 0 : index
    %c0_18 = arith.constant 0 : index
    %27 = vector.load %arg6[%c0_17, %c0_18] : memref<128x128xf32, #tpu.memory_space<vmem>>, vector<128x128xf32>
    %cst_19 = arith.constant dense<0.000000e+00> : vector<8x128xf32>
    %28 = tpu.matmul %26, %27, %cst_19 {dimension_numbers = #tpu.dot_dimension_numbers<[1], [0], [0], [1], [0, 0, 1, 1], [], []>} : vector<8x128xf32>, vector<128x128xf32>, vector<8x128xf32> -> vector<8x128xf32>
    %c0_20 = arith.constant 0 : index
    %c0_21 = arith.constant 0 : index
    %29 = vector.load %arg7[%c0_20, %c0_21] : memref<1x128xf32, #tpu.memory_space<vmem>>, vector<1x128xf32>
    %30 = vector.broadcast %29 : vector<1x128xf32> to vector<8x128xf32>
    %31 = arith.addf %28, %30 : vector<8x128xf32>
    %cst_22 = arith.constant 0.000000e+00 : f32
    %32 = vector.broadcast %cst_22 : f32 to vector<8x128xf32>
    %33 = arith.maximumf %31, %32 : vector<8x128xf32>
    %c0_23 = arith.constant 0 : index
    %c0_24 = arith.constant 0 : index
    %34 = vector.load %arg8[%c0_23, %c0_24] : memref<128x128xf32, #tpu.memory_space<vmem>>, vector<128x128xf32>
    %cst_25 = arith.constant dense<0.000000e+00> : vector<8x128xf32>
    %35 = tpu.matmul %33, %34, %cst_25 {dimension_numbers = #tpu.dot_dimension_numbers<[1], [0], [0], [1], [0, 0, 1, 1], [], []>} : vector<8x128xf32>, vector<128x128xf32>, vector<8x128xf32> -> vector<8x128xf32>
    %c0_26 = arith.constant 0 : index
    %c0_27 = arith.constant 0 : index
    %36 = vector.load %arg9[%c0_26, %c0_27] : memref<1x128xf32, #tpu.memory_space<vmem>>, vector<1x128xf32>
    %37 = vector.broadcast %36 : vector<1x128xf32> to vector<8x128xf32>
    %38 = arith.addf %35, %37 : vector<8x128xf32>
    %c0_28 = arith.constant 0 : index
    %c0_29 = arith.constant 0 : index
    %39 = vector.load %arg10[%c0_28, %c0_29] : memref<8x128xf32, #tpu.memory_space<vmem>>, vector<8x128xf32>
    tpu.vector_store %arg10[%c0_28, %c0_29], %38 {strides = array<i32>} : memref<8x128xf32, #tpu.memory_space<vmem>>, vector<8x128xf32>,
    return
  }
  func.func @transform_0(%arg0: i32) -> (i32, i32) {
    %c0_i32 = arith.constant 0 : i32
    %c0_i32_0 = arith.constant 0 : i32
    return %arg0, %c0_i32 : i32, i32
  }
  func.func @transform_1(%arg0: i32) -> (i32, i32) {
    %c0_i32 = arith.constant 0 : i32
    %c0_i32_0 = arith.constant 0 : i32
    %c0_i32_1 = arith.constant 0 : i32
    return %c0_i32, %c0_i32_0 : i32, i32
  }
  func.func @transform_2(%arg0: i32) -> (i32, i32) {
    %c0_i32 = arith.constant 0 : i32
    %c0_i32_0 = arith.constant 0 : i32
    %c0_i32_1 = arith.constant 0 : i32
    return %c0_i32, %c0_i32_0 : i32, i32
  }
  func.func @transform_3(%arg0: i32) -> (i32, i32) {
    %c0_i32 = arith.constant 0 : i32
    %c0_i32_0 = arith.constant 0 : i32
    %c0_i32_1 = arith.constant 0 : i32
    return %c0_i32, %c0_i32_0 : i32, i32
  }
  func.func @transform_4(%arg0: i32) -> (i32, i32) {
    %c0_i32 = arith.constant 0 : i32
    %c0_i32_0 = arith.constant 0 : i32
    %c0_i32_1 = arith.constant 0 : i32
    return %c0_i32, %c0_i32_0 : i32, i32
  }
  func.func @transform_5(%arg0: i32) -> (i32, i32) {
    %c0_i32 = arith.constant 0 : i32
    %c0_i32_0 = arith.constant 0 : i32
    %c0_i32_1 = arith.constant 0 : i32
    return %c0_i32, %c0_i32_0 : i32, i32
  }
  func.func @transform_6(%arg0: i32) -> (i32, i32) {
    %c0_i32 = arith.constant 0 : i32
    %c0_i32_0 = arith.constant 0 : i32
    %c0_i32_1 = arith.constant 0 : i32
    return %c0_i32, %c0_i32_0 : i32, i32
  }
  func.func @transform_7(%arg0: i32) -> (i32, i32) {
    %c0_i32 = arith.constant 0 : i32
    %c0_i32_0 = arith.constant 0 : i32
    %c0_i32_1 = arith.constant 0 : i32
    return %c0_i32, %c0_i32_0 : i32, i32
  }
  func.func @transform_8(%arg0: i32) -> (i32, i32) {
    %c0_i32 = arith.constant 0 : i32
    %c0_i32_0 = arith.constant 0 : i32
    %c0_i32_1 = arith.constant 0 : i32
    return %c0_i32, %c0_i32_0 : i32, i32
  }
  func.func @transform_9(%arg0: i32) -> (i32, i32) {
    %c0_i32 = arith.constant 0 : i32
    %c0_i32_0 = arith.constant 0 : i32
    return %arg0, %c0_i32 : i32, i32
  }
}

</mosaic_0001>

<bundles_post_ra>
// kernel: tpu_custom_call.1
= control target key start
LH: loop header
LB: loop body
LE: loop exit
PB: predicated region body
PF: predicated region fallthrough
CT: control target
= control target key end

     0   :  { %14 = vsyncpa [#allocation3], 0  ;;  %s1445_s0 = inlined_call_operand.hbm [shape: f32[8,8], index: 0, kind: input, shape index: {}]   ;;  %s1446_s1 = inlined_call_operand.hbm [shape: f32[8,128], index: 1, kind: input, shape index: {}]   ;;  %s1447_s2 = inlined_call_operand.hbm [shape: f32[40,128], index: 2, kind: input, shape index: {}]   ;;  %s1448_s3 = inlined_call_operand.hbm [shape: f32[40,128], index: 3, kind: input, shape index: {}]   ;;  %s1449_s4 = inlined_call_operand.vmem [shape: f32[1,128], index: 4, kind: input, shape index: {}]   ;;  %s1450_s5 = inlined_call_operand.hbm [shape: f32[128,128], index: 5, kind: input, shape index: {}]   ;;  %s1451_s6 = inlined_call_operand.vmem [shape: f32[1,128], index: 6, kind: input, shape index: {}]   ;;  %s1452_s7 = inlined_call_operand.hbm [shape: f32[128,128], index: 7, kind: input, shape index: {}]   ;;  %s1453_s8 = inlined_call_operand.vmem [shape: f32[1,128], index: 8, kind: input, shape index: {}]   ;;  %s1454_s9 = inlined_call_operand.hbm [shape: f32[8,128], index: 9, kind: output, shape index: {}]  }
   0x1   :  { %15 = vsyncpa [#allocation6], 0 }
   0x2   :  { %16 = vsyncpa [#allocation9], 0 }
   0x3   :  { %17 = vsyncpa [#allocation12], 0 }
   0x4   :  { %18 = vsyncpa [#allocation4], 0  ;;  %s1210_s30 = smov [#allocation5]   ;;  %s1046_s13 = scalar_lea.hbm %s1446_s1, 128 }
   0x5   :  { %s35_s10 = sshll.u32 %s1210_s30, 4  ;;  %p1047_p0 = scmp.ne.s32.totalorder %s1446_s1, %s1046_s13  ;;  %s36_s10 = int_to_ptr.vmem [resolvable:$true] %s35_s10 }
   0x6   :  { %p1050_p1 = scmp.lt.u32.totalorder %s1046_s13, %s1446_s1 }
   0x8   :  { %p1052_p2 = pnand %p1050_p1, %p1047_p0 }
   0xa   :  { %1055 = shalt.err (!%p1052_p2)
}
   0xb   :  { %s1056_s18 = scalar_lea.vmem %s36_s10, 128  ;;  %p1061_p4 = scmp.lt.s32.totalorder %s36_s10, %s36_s10 }
   0xc   :  { %p1057_p3 = scmp.ne.s32.totalorder %s36_s10, %s1056_s18  ;;  %p1062_p5 = scmp.lt.s32.totalorder %s1056_s18, %s1056_s18 }
   0xe   :  { %p1063_p6 = por %p1062_p5, %p1061_p4 }
  0x10   :  { %p1064_p7 = pnand %p1063_p6, %p1057_p3 }
  0x12   :  { %1067 = shalt.err (!%p1064_p7)
}
  0x13   :  { %38 = dma.hbm_to_vmem [thread:$0]  %s1446_s1, 128, %s36_s10, [#allocation6]  }
  0x14   :  { %s1211_s21 = smov [#allocation8]   ;;  %s1212_s23 = smov [#allocation2]  }
  0x15   :  { %s56_s22 = sshll.u32 %s1211_s21, 4  ;;  %s25_s24 = sshll.u32 %s1212_s23, 4  ;;  %s57_s22 = int_to_ptr.vmem [resolvable:$true] %s56_s22  ;;  %s26_s24 = int_to_ptr.vmem [resolvable:$true] %s25_s24 }
  0x16   :  { %s1068_s27 = scalar_lea.hbm %s1448_s3, 640 }
  0x17   :  { %p1069_p8 = scmp.ne.s32.totalorder %s1448_s3, %s1068_s27  ;;  %p1072_p9 = scmp.lt.u32.totalorder %s1068_s27, %s1448_s3 }
  0x19   :  { %p1074_p10 = pnand %p1072_p9, %p1069_p8 }
  0x1b   :  { %1077 = shalt.err (!%p1074_p10)
}
  0x1c   :  { %s1078_s1 = scalar_lea.vmem %s57_s22, 640  ;;  %p1083_p12 = scmp.lt.s32.totalorder %s57_s22, %s57_s22 }
  0x1d   :  { %p1079_p11 = scmp.ne.s32.totalorder %s57_s22, %s1078_s1  ;;  %p1084_p13 = scmp.lt.s32.totalorder %s1078_s1, %s1078_s1 }
  0x1f   :  { %p1085_p0 = por %p1084_p13, %p1083_p12 }
  0x21   :  { %p1086_p1 = pnand %p1085_p0, %p1079_p11 }
  0x23   :  { %1089 = shalt.err (!%p1086_p1)
}
  0x24   :  { %s1213_s10 = smov 128   ;;  %s1214_s12 = smov 8  }
  0x25   :  { %62 = dma.hbm_to_vmem [thread:$0]  %s1448_s3, 640, %s57_s22, [#allocation9], %s1213_s10, %s1213_s10, %s1214_s12  }
  0x26   :  { %s1090_s17 = scalar_lea.hbm %s1445_s0, 128 }
  0x27   :  { %p1091_p2 = scmp.ne.s32.totalorder %s1445_s0, %s1090_s17  ;;  %p1094_p3 = scmp.lt.u32.totalorder %s1090_s17, %s1445_s0 }
  0x29   :  { %p1096_p4 = pnand %p1094_p3, %p1091_p2 }
  0x2b   :  { %1099 = shalt.err (!%p1096_p4)
}
  0x2c   :  { %s1100_s23 = scalar_lea.vmem %s26_s24, 128  ;;  %p1105_p6 = scmp.lt.s32.totalorder %s26_s24, %s26_s24 }
  0x2d   :  { %p1101_p5 = scmp.ne.s32.totalorder %s26_s24, %s1100_s23  ;;  %p1106_p7 = scmp.lt.s32.totalorder %s1100_s23, %s1100_s23 }
  0x2f   :  { %p1107_p8 = por %p1106_p7, %p1105_p6 }
  0x31   :  { %p1108_p9 = pnand %p1107_p8, %p1101_p5 }
  0x33   :  { %1111 = shalt.err (!%p1108_p9)
}
  0x34   :  { %28 = dma.hbm_to_vmem [thread:$0]  %s1445_s0, 128, %s26_s24, [#allocation3]  }
  0x35   :  { %s1215_s25 = smov [#allocation7]   ;;  %s1216_s27 = smov [#allocation10]  }
  0x36   :  { %s44_s26 = sshll.u32 %s1215_s25, 4  ;;  %s70_s28 = sshll.u32 %s1216_s27, 4  ;;  %s45_s26 = int_to_ptr.vmem [resolvable:$true] %s44_s26  ;;  %s71_s28 = int_to_ptr.vmem [resolvable:$true] %s70_s28 }
  0x37   :  { %s1112_s11 = scalar_lea.hbm %s1447_s2, 640 }
  0x38   :  { %p1113_p10 = scmp.ne.s32.totalorder %s1447_s2, %s1112_s11  ;;  %p1116_p11 = scmp.lt.u32.totalorder %s1112_s11, %s1447_s2 }
  0x3a   :  { %p1118_p12 = pnand %p1116_p11, %p1113_p10 }
  0x3c   :  { %1121 = shalt.err (!%p1118_p12)
}
  0x3d   :  { %s1122_s0 = scalar_lea.vmem %s45_s26, 640  ;;  %p1127_p0 = scmp.lt.s32.totalorder %s45_s26, %s45_s26 }
  0x3e   :  { %p1123_p13 = scmp.ne.s32.totalorder %s45_s26, %s1122_s0  ;;  %p1128_p1 = scmp.lt.s32.totalorder %s1122_s0, %s1122_s0 }
  0x40   :  { %p1129_p2 = por %p1128_p1, %p1127_p0 }
  0x42   :  { %p1130_p3 = pnand %p1129_p2, %p1123_p13 }
  0x44   :  { %1133 = shalt.err (!%p1130_p3)
}
  0x45   :  { %50 = dma.hbm_to_vmem [thread:$0]  %s1447_s2, 640, %s45_s26, [#allocation6], %s1213_s10, %s1213_s10, %s1214_s12  }
  0x46   :  { %s1134_s19 = scalar_lea.hbm %s1450_s5, 2048 }
  0x47   :  { %p1135_p4 = scmp.ne.s32.totalorder %s1450_s5, %s1134_s19  ;;  %p1138_p5 = scmp.lt.u32.totalorder %s1134_s19, %s1450_s5 }
  0x49   :  { %p1140_p6 = pnand %p1138_p5, %p1135_p4 }
  0x4b   :  { %1143 = shalt.err (!%p1140_p6)
}
  0x4c   :  { %s1144_s22 = scalar_lea.vmem %s71_s28, 2048  ;;  %p1149_p8 = scmp.lt.s32.totalorder %s71_s28, %s71_s28 }
  0x4d   :  { %p1145_p7 = scmp.ne.s32.totalorder %s71_s28, %s1144_s22  ;;  %p1150_p9 = scmp.lt.s32.totalorder %s1144_s22, %s1144_s22 }
  0x4f   :  { %p1151_p10 = por %p1150_p9, %p1149_p8 }
  0x51   :  { %p1152_p11 = pnand %p1151_p10, %p1145_p7 }
  0x53   :  { %1155 = shalt.err (!%p1152_p11)
}
  0x54   :  { %76 = dma.hbm_to_vmem [thread:$0]  %s1450_s5, 2048, %s71_s28, [#allocation9], %s1213_s10, %s1213_s10, %s1214_s12  }
  0x55   :  { %s1217_s26 = smov [#allocation11]   ;;  %s1156_s11 = scalar_lea.hbm %s1452_s7, 2048 }
  0x56   :  { %s84_s27 = sshll.u32 %s1217_s26, 4  ;;  %p1157_p12 = scmp.ne.s32.totalorder %s1452_s7, %s1156_s11  ;;  %s85_s27 = int_to_ptr.vmem [resolvable:$true] %s84_s27 }
  0x57   :  { %p1160_p13 = scmp.lt.u32.totalorder %s1156_s11, %s1452_s7 }
  0x59   :  { %p1162_p0 = pnand %p1160_p13, %p1157_p12 }
  0x5b   :  { %1165 = shalt.err (!%p1162_p0)
}
  0x5c   :  { %s1166_s0 = scalar_lea.vmem %s85_s27, 2048  ;;  %p1171_p2 = scmp.lt.s32.totalorder %s85_s27, %s85_s27 }
  0x5d   :  { %p1167_p1 = scmp.ne.s32.totalorder %s85_s27, %s1166_s0  ;;  %p1172_p3 = scmp.lt.s32.totalorder %s1166_s0, %s1166_s0 }
  0x5f   :  { %p1173_p4 = por %p1172_p3, %p1171_p2 }
  0x61   :  { %p1174_p5 = pnand %p1173_p4, %p1167_p1 }
  0x63   :  { %1177 = shalt.err (!%p1174_p5)
}
  0x64   :  { %90 = dma.hbm_to_vmem [thread:$0]  %s1452_s7, 2048, %s85_s27, [#allocation12], %s1213_s10, %s1213_s10, %s1214_s12  }
  0x65   :  { %1200 = dma.done.wait [#allocation3], 128  }
  0x66   :  { %1201 = vsyncadd [#allocation3], 4294967168 }
  0x67   :  { %1202 = dma.done.wait [#allocation6], 768  }
  0x68   :  { %1203 = vsyncadd [#allocation6], 4294966528 }
  0x69   :  { %1204 = dma.done.wait [#allocation9], 2688  }
  0x6a   :  { %1205 = vsyncadd [#allocation9], 4294964608 }
  0x6b   :  { %1206 = dma.done.wait [#allocation12], 2048  }
  0x6c   :  { %1207 = vsyncadd [#allocation12], 4294965248  ;;  %v111_v0 = vld [vmem:[#allocation2] sm:$0xff]  ;;  %s1218_s24 = smov 24   ;;  %s1219_s16 = smov 16   ;;  %v140_v5 = vld [vmem:[#allocation5] sm:$0xff] }
  0x6d   :  { %v112_v1 = vmul.f32 2.19328, %v111_v0  ;;  %v114_v2 = vmul.f32 10.550724, %v111_v0  ;;  %v113_v3 = vmul.f32 4.8104773, %v111_v0 }
  0x6e   :  { %v115_v4 = vmul.f32 23.140692, %v111_v0  ;;  %s1220_s7 = smov 32   ;;  %v245_v6 = vld [vmem:[#allocation7] sm:$0xff]  ;;  %v246_v7 = vld [vmem:[#allocation7 + $0x8] sm:$0xff]  ;;  %v1221_v8 = vmov 0.0  }
  0x6f   :  { %117 = vrot.lane.b32.xlu0 %v112_v1, %s1214_s12  ;;  %125 = vrot.lane.b32.xlu1 %v114_v2, %s1218_s24  ;;  %v1222_v9 = vmov 0.0|0.0   ;;  %v958_v10 = vpack.c.bf16 %v246_v7, %v245_v6  ;;  %v500_v11 = vld [vmem:[#allocation8] sm:$0xff]  ;;  %v501_v12 = vld [vmem:[#allocation8 + $0x8] sm:$0xff]  ;;  %vm1223_vm0 = vmmov 0   ;;  %v248_v15 = vld [vmem:[#allocation7 + $0x18] sm:$0xff]  ;;  %vm132_vm1 = vcmask 64512  }
  0x70   :  { %869 = vmatprep.subr.mxu1 %v1221_v8  ;;  %957 = vmatprep.subr.bf16.mxu0 %v1222_v9  ;;  %v247_v13 = vld [vmem:[#allocation7 + $0x10] sm:$0xff]  ;;  %v964_v14 = vpack.c.bf16 %v501_v12, %v500_v11  ;;  %v502_v16 = vld [vmem:[#allocation8 + $0x10] sm:$0xff]  ;;  %v503_v17 = vld [vmem:[#allocation8 + $0x18] sm:$0xff]  ;;  %vm134_vm2 = vcmask 130048   ;;  %vm136_vm3 = vcmask 195584   ;;  %vm138_vm4 = vcmask 261120  }
  0x71   :  { %870 = vmatpush3.msra.mxu1 %v140_v5  ;;  %871 = vmatprep.mubr.msk.f32.mxu1 %vm1223_vm0, %v1221_v8  ;;  %v961_v18 = vpack.c.bf16 %v248_v15, %v247_v13  ;;  %v967_v19 = vpack.c.bf16 %v503_v17, %v502_v16  ;;  %v249_v20 = vld [vmem:[#allocation7 + $0x20] sm:$0xff]  ;;  %v504_v21 = vld [vmem:[#allocation8 + $0x20] sm:$0xff]  ;;  %v1224_v40 = vmov 683565275   ;;  %v1225_v42 = vmov 2475754826  }
  0x72   :  { %963 = vmatprep.subr.bf16.mxu1 %v1222_v9  ;;  %959 = vmatpush3.bf16.msra.mxu0 %v958_v10  ;;  %v1226_v45 = vmov 2131351028   ;;  %v1227_v48 = vmov 2102212464   ;;  %v1228_v51 = vmov 920167782  }
  0x73   :  { %121 = vrot.lane.b32.xlu0 %v113_v3, %s1219_s16  ;;  %129 = vrot.lane.b32.xlu1 %v115_v4, %s1220_s7  ;;  %v1229_v54 = vmov 1326507024   ;;  %vm250_vm14 = vcmask 326656  }
  0x74   :  { %872 = vmatmul.mubr.msk.f32.vlgmr.msra.gmra.mrb[0].mxu1 %vm132_vm1, %v111_v0  ;;  %960 = vmatprep.subr.bf16.mxu0 %v1222_v9 }
  0x75   :  { %965 = vmatpush3.bf16.msra.mxu1 %v964_v14  ;;  %866 = vmatprep.mubr.msk.f32.mxu0 %vm1223_vm0, %v1221_v8 }
  0x76   :  { %966 = vmatprep.subr.bf16.mxu1 %v1222_v9  ;;  %884 = vmatprep.mubr.msk.f32.mxu1 %vm1223_vm0, %v1221_v8 }
  0x77   :  { %962 = vmatpush3.bf16.msra.mxu0 %v961_v18 }
  0x78   :  { %864 = vmatprep.subr.mxu0 %v1221_v8 }
  0x79   :  { %968 = vmatpush3.bf16.msra.mxu1 %v967_v19 }
  0x7a   :  { %882 = vmatprep.subr.mxu1 %v1221_v8 }
  0x7b   :  { %865 = vmatpush3.msra.mxu0 %v249_v20 }
  0x7c   :  { %969 = vmatprep.subr.bf16.mxu0 %v1222_v9 }
  0x7d   :  { %883 = vmatpush3.msra.mxu1 %v504_v21 }
  0x7e   :  { %993 = vmatprep.subr.bf16.mxu1 %v1222_v9 }
  0xe1   :  { %v118_v22 = vpop.permute.xlu0 %117  ;;  %v126_v23 = vpop.permute.xlu1 %125 }
  0xe2   :  { %v133_v24 = vsel %vm132_vm1, %v111_v0, %v118_v22 }
  0xe5   :  { %v122_v25 = vpop.permute.xlu0 %121  ;;  %v130_v26 = vpop.permute.xlu1 %129 }
  0xe6   :  { %v135_v27 = vsel %vm134_vm2, %v133_v24, %v122_v25 }
  0xe7   :  { %v137_v28 = vsel %vm136_vm3, %v135_v27, %v126_v23 }
  0xe8   :  { %v1383_v29 = vsel %vm138_vm4, %v137_v28, %v130_v26 }
  0xe9   :  { %v144_v30 = vand.u32 2139095040, %v1383_v29  ;;  %v141_v34 = vand.u32 2147483647, %v1383_v29  ;;  %vm143_vm12 = vcmp.lt.s32.totalorder %v1383_v29, 0 }
  0xeb   :  { %v145_v31 = vshrl.u32 %v144_v30, 23  ;;  %v148_v37 = vand.u32 8388607, %v141_v34  ;;  %vm142_vm13 = vcmp.le.f32.partialorder %v141_v34, 0.7853982 }
  0xed   :  { %v794_v32 = vadd.s32 4294967169, %v145_v31  ;;  %v149_v56 = vor.u32 8388608, %v148_v37 }
  0xef   :  { %v151_v33 = vadd.s32 1, %v794_v32  ;;  %v189_v6 = vshll.u32 %v149_v56, 8 }
  0xf1   :  { %vm152_vm5 = vcmp.gt.s32.totalorder %v151_v33, 0 }
  0xf2   :  { %v153_v35 = vsel %vm152_vm5, %v151_v33, 0 }
  0xf3   :  { %v155_v36 = vand.u32 31, %v153_v35  ;;  %v154_v39 = vshrl.u32 %v153_v35, 5 }
  0xf5   :  { %v156_v38 = vsub.s32 32, %v155_v36  ;;  %v158_v41 = vshll.u32 %v1224_v40, %v155_v36  ;;  %v161_v43 = vshll.u32 %v1225_v42, %v155_v36  ;;  %v164_v47 = vshll.u32 %v1226_v45, %v155_v36 }
  0xf6   :  { %v167_v50 = vshll.u32 %v1227_v48, %v155_v36  ;;  %v170_v53 = vshll.u32 %v1228_v51, %v155_v36  ;;  %vm173_vm6 = vcmp.lt.s32.totalorder %v154_v39, 1  ;;  %vm176_vm7 = vcmp.lt.s32.totalorder %v154_v39, 4 }
  0xf7   :  { %v159_v44 = vshrl.u32 %v1225_v42, %v156_v38  ;;  %v162_v46 = vshrl.u32 %v1226_v45, %v156_v38  ;;  %v165_v49 = vshrl.u32 %v1227_v48, %v156_v38  ;;  %v168_v52 = vshrl.u32 %v1228_v51, %v156_v38 }
  0xf8   :  { %v171_v55 = vshrl.u32 %v1229_v54, %v156_v38  ;;  %v157_v1 = vshrl.u32 %v1224_v40, %v156_v38  ;;  %vm175_vm8 = vcmp.lt.s32.totalorder %v154_v39, 3  ;;  %vm174_vm9 = vcmp.lt.s32.totalorder %v154_v39, 2  ;;  %v588_v54 = vld [vmem:[#allocation10] sm:$0xff] }
  0xf9   :  { %v160_v57 = vor.u32 %v159_v44, %v158_v41  ;;  %v163_v58 = vor.u32 %v162_v46, %v161_v43  ;;  %v166_v59 = vor.u32 %v165_v49, %v164_v47  ;;  %v169_v60 = vor.u32 %v168_v52, %v167_v50 }
  0xfa   :  { %v172_v61 = vor.u32 %v171_v55, %v170_v53  ;;  %v589_v55 = vld [vmem:[#allocation10 + $0x8] sm:$0xff] }
  0xfb   :  { %v178_v62 = vsel %vm176_vm7, %v166_v59, 2102212464  ;;  %v181_v63 = vsel %vm173_vm6, %v160_v57, %v163_v58  ;;  %v185_v0 = vsel %vm173_vm6, %v163_v58, %v166_v59  ;;  %v182_v2 = vsel %vm176_vm7, %v169_v60, 920167782 }
  0xfc   :  { %v186_v3 = vsel %vm176_vm7, %v172_v61, 1326507024  ;;  %v183_v4 = vsel %vm175_vm8, %v166_v59, %v182_v2  ;;  %v177_v7 = vsel %vm173_vm6, %v157_v1, %v160_v57  ;;  %v179_v10 = vsel %vm175_vm8, %v163_v58, %v178_v62  ;;  %v590_v2 = vld [vmem:[#allocation10 + $0x10] sm:$0xff] }
  0xfd   :  { %v187_v5 = vsel %vm175_vm8, %v169_v60, %v186_v3  ;;  %v184_v11 = vsel %vm174_vm9, %v181_v63, %v183_v4  ;;  %v180_v17 = vsel %vm174_vm9, %v177_v7, %v179_v10  ;;  %v970_v34 = vpack.c.bf16 %v589_v55, %v588_v54  ;;  %v591_v3 = vld [vmem:[#allocation10 + $0x18] sm:$0xff]  ;;  %v592_v7 = vld [vmem:[#allocation10 + $0x20] sm:$0xff]  ;;  %v593_v10 = vld [vmem:[#allocation10 + $0x28] sm:$0xff] }
  0xfe   :  { %v188_v12 = vsel %vm174_vm9, %v185_v0, %v187_v5  ;;  %v1392_v15 = vmul.u32.u64.low %v189_v6, %v184_v11  ;;  %v1393_v16 = vmul.u32.u64.high %v189_v6, %v184_v11, %v1392_v15  ;;  %v196_v19 = vmul.u32 %v189_v6, %v180_v17  ;;  %v594_v11 = vld [vmem:[#allocation10 + $0x30] sm:$0xff]  ;;  %v805_v55 = vld [vmem:[%s1449_s4] ss:$0 sm:$0xff]  ;;  %s1230_s4 = smov [#allocation13]  }
  0xff   :  { %v1389_v13 = vmul.u32.u64.low %v189_v6, %v188_v12  ;;  %v1390_v14 = vmul.u32.u64.high %v189_v6, %v188_v12, %v1389_v13  ;;  %vm233_vm6 = vweird.f32 %v1383_v29  ;;  %v973_v6 = vpack.c.bf16 %v591_v3, %v590_v2  ;;  %v595_v12 = vld [vmem:[#allocation10 + $0x38] sm:$0xff]  ;;  %v598_v17 = vld [vmem:[#allocation10 + $0x50] sm:$0xff]  ;;  %s782_s21 = sshll.u32 %s1230_s4, 4  ;;  %s783_s21 = int_to_ptr.vmem [resolvable:$true] %s782_s21 }
 0x100   :  { %v199_v18 = vadd.s32 1, %v1393_v16  ;;  %v979_v13 = vpack.c.bf16 %v595_v12, %v594_v11  ;;  %s1178_s23 = scalar_lea.vmem %s783_s21, 128  ;;  %p1183_p7 = scmp.lt.s32.totalorder %s783_s21, %s783_s21 }
 0x101   :  { %vm198_vm10 = vc.u32 %v1390_v14, %v1392_v15  ;;  %v197_v32 = vadd.s32 %v1392_v15, %v1390_v14  ;;  %v596_v14 = vld [vmem:[#allocation10 + $0x40] sm:$0xff]  ;;  %v597_v15 = vld [vmem:[#allocation10 + $0x48] sm:$0xff]  ;;  %p1179_p6 = scmp.ne.s32.totalorder %s783_s21, %s1178_s23  ;;  %p1184_p8 = scmp.lt.s32.totalorder %s1178_s23, %s1178_s23 }
 0x102   :  { %v200_v20 = vsel %vm198_vm10, %v199_v18, %v1393_v16  ;;  %v982_v16 = vpack.c.bf16 %v597_v15, %v596_v14  ;;  %v599_v18 = vld [vmem:[#allocation10 + $0x58] sm:$0xff] }
 0x103   :  { %v201_v21 = vadd.s32 %v200_v20, %v196_v19  ;;  %p1185_p9 = por %p1184_p8, %p1183_p7 }
 0x105   :  { %v202_v22 = vadd.s32 536870912, %v201_v21  ;;  %p1186_p10 = pnand %p1185_p9, %p1179_p6 }
 0x107   :  { %v203_v23 = vshrl.u32 %v202_v22, 30  ;;  %v601_v22 = vld [vmem:[#allocation10 + $0x68] sm:$0xff] }
 0x109   :  { %v204_v24 = vshll.u32 %v203_v23, 30  ;;  %v227_v45 = vsub.s32 4, %v203_v23 }
 0x10b   :  { %v205_v25 = vsub.s32 %v201_v21, %v204_v24  ;;  %v228_v48 = vsel %vm143_vm12, %v227_v45, %v203_v23  ;;  %v600_v21 = vld [vmem:[#allocation10 + $0x60] sm:$0xff]  ;;  %v602_v24 = vld [vmem:[#allocation10 + $0x70] sm:$0xff]  ;;  %v693_v45 = vld [vmem:[#allocation11 + $0x58] sm:$0xff] }
 0x10c   :  { %v230_v50 = vsel %vm142_vm13, 0, %v228_v48  ;;  %v988_v23 = vpack.c.bf16 %v601_v22, %v600_v21  ;;  %v695_v48 = vld [vmem:[#allocation11 + $0x68] sm:$0xff] }
 0x10d   :  { %v207_v26 = vsub.s32 0, %v205_v25  ;;  %v234_v51 = vadd.s32 3, %v230_v50  ;;  %v490_v52 = vand.u32 3, %v230_v50 }
 0x10f   :  { %v795_v27 = vmin.u32 %v207_v26, %v205_v25  ;;  %v235_v53 = vand.u32 3, %v234_v51  ;;  %vm495_vm1 = vcmp.eq.s32.totalorder %v490_v52, 2  ;;  %vm492_vm3 = vcmp.eq.s32.totalorder %v490_v52, 0 }
 0x110   :  { %vm491_vm5 = vcmp.lt.s32.totalorder %v490_v52, 2 }
 0x111   :  { %v209_v28 = vclz %v795_v27  ;;  %vm240_vm15 = vcmp.eq.s32.totalorder %v235_v53, 2  ;;  %vm237_vm2 = vcmp.eq.s32.totalorder %v235_v53, 0  ;;  %vm236_vm4 = vcmp.lt.s32.totalorder %v235_v53, 2  ;;  %v682_v27 = vld [vmem:[#allocation11] sm:$0xff] }
 0x113   :  { %v796_v30 = vadd.s32 4294967294, %v209_v28  ;;  %v683_v28 = vld [vmem:[#allocation11 + $0x8] sm:$0xff] }
 0x115   :  { %vm797_vm11 = vcmp.lt.s32.totalorder %v796_v30, 0 }
 0x116   :  { %v212_v31 = vsel %vm797_vm11, 0, %v796_v30  ;;  %v684_v30 = vld [vmem:[#allocation11 + $0x10] sm:$0xff] }
 0x117   :  { %v213_v33 = vsub.s32 32, %v212_v31  ;;  %v217_v35 = vsub.s32 4294967266, %v212_v31  ;;  %v214_v36 = vshll.u32 %v205_v25, %v212_v31  ;;  %v603_v25 = vld [vmem:[#allocation10 + $0x78] sm:$0xff]  ;;  %v994_v31 = vpack.c.bf16 %v683_v28, %v682_v27 }
 0x118   :  { %v991_v26 = vpack.c.bf16 %v603_v25, %v602_v24 }
 0x119   :  { %v215_v37 = vshrl.u32 %v197_v32, %v213_v33  ;;  %v218_v38 = vadd.s32 127, %v217_v35  ;;  %v685_v32 = vld [vmem:[#allocation11 + $0x18] sm:$0xff]  ;;  %v686_v35 = vld [vmem:[#allocation11 + $0x20] sm:$0xff] }
 0x11a   :  { %v997_v33 = vpack.c.bf16 %v685_v32, %v684_v30 }
 0x11b   :  { %v216_v39 = vor.u32 %v215_v37, %v214_v36  ;;  %v219_v40 = vshll.u32 %v218_v38, 23  ;;  %v687_v36 = vld [vmem:[#allocation11 + $0x28] sm:$0xff]  ;;  %v688_v38 = vld [vmem:[#allocation11 + $0x30] sm:$0xff] }
 0x11c   :  { %v1000_v37 = vpack.c.bf16 %v687_v36, %v686_v35 }
 0x11d   :  { %v220_v41 = vor.u32 4788187, %v219_v40  ;;  %v223_v43 = vcvt.s32.f32 %v216_v39  ;;  %v689_v39 = vld [vmem:[#allocation11 + $0x38] sm:$0xff] }
 0x11e   :  { %v1003_v40 = vpack.c.bf16 %v689_v39, %v688_v38 }
 0x11f   :  { %v221_v42 = vand.u32 2147483647, %v220_v41  ;;  %v690_v41 = vld [vmem:[#allocation11 + $0x40] sm:$0xff] }
 0x121   :  { %v224_v44 = vmul.f32 %v223_v43, %v221_v42  ;;  %v691_v42 = vld [vmem:[#allocation11 + $0x48] sm:$0xff] }
 0x122   :  { %v1006_v43 = vpack.c.bf16 %v691_v42, %v690_v41 }
 0x123   :  { %v225_v46 = vxor.u32 2147483648, %v224_v44 }
 0x125   :  { %v226_v47 = vsel %vm143_vm12, %v225_v46, %v224_v44  ;;  %v692_v44 = vld [vmem:[#allocation11 + $0x50] sm:$0xff] }
 0x126   :  { %v229_v49 = vsel %vm142_vm13, %v1383_v29, %v226_v47  ;;  %v976_v29 = vpack.c.bf16 %v593_v10, %v592_v7  ;;  %v1009_v46 = vpack.c.bf16 %v693_v45, %v692_v44  ;;  %v694_v47 = vld [vmem:[#allocation11 + $0x60] sm:$0xff] }
 0x127   :  { %1042 = vcosq.f32 %v229_v49 }
 0x128   :  { %1044 = vsinq.f32 %v229_v49  ;;  %v1012_v49 = vpack.c.bf16 %v695_v48, %v694_v47 }
 0x131   :  { %v1043_v56 = vpop.eup %1042 }
 0x132   :  { %v1045_v57 = vpop.eup %1044  ;;  %v241_v58 = vxor.u32 2147483648, %v1043_v56 }
 0x133   :  { %v238_v59 = vxor.u32 2147483648, %v1045_v57 }
 0x134   :  { %v242_v60 = vsel %vm240_vm15, %v241_v58, %v1045_v57  ;;  %v497_v61 = vsel %vm495_vm1, %v241_v58, %v1045_v57 }
 0x135   :  { %v239_v62 = vsel %vm237_vm2, %v1043_v56, %v238_v59  ;;  %v494_v63 = vsel %vm492_vm3, %v1043_v56, %v238_v59  ;;  %v696_v59 = vld [vmem:[#allocation11 + $0x70] sm:$0xff] }
 0x136   :  { %v243_v0 = vsel %vm236_vm4, %v239_v62, %v242_v60  ;;  %v498_v1 = vsel %vm491_vm5, %v494_v63, %v497_v61 }
 0x137   :  { %v244_v4 = vsel %vm233_vm6, nan, %v243_v0  ;;  %v499_v5 = vsel %vm233_vm6, nan, %v498_v1  ;;  %v807_v1 = vld [vmem:[%s1453_s8] ss:$0 sm:$0xff] }
 0x138   :  { %867 = vmatmul.mubr.msk.f32.vlgmr.msra.gmra.mrb[0].mxu0 %vm250_vm14, %v244_v4  ;;  %885 = vmatmul.mubr.msk.f32.vlgmr.msra.gmra.mrb[2].mxu1 %vm250_vm14, %v499_v5 }
 0x139   :  { %971 = vmatpush3.bf16.msra.mxu0 %v970_v34  ;;  %919 = vmatprep.mubr.msk.f32.mxu0 %vm1223_vm0, %v1221_v8  ;;  %v697_v34 = vld [vmem:[#allocation11 + $0x78] sm:$0xff] }
 0x13a   :  { %972 = vmatprep.subr.bf16.mxu0 %v1222_v9  ;;  %954 = vmatprep.mubr.msk.f32.mxu1 %vm1223_vm0, %v1221_v8  ;;  %v985_v8 = vpack.c.bf16 %v599_v18, %v598_v17  ;;  %v1015_v60 = vpack.c.bf16 %v697_v34, %v696_v59 }
 0x13b   :  { %995 = vmatpush3.bf16.msra.mxu1 %v994_v31 }
 0x13c   :  { %996 = vmatprep.subr.bf16.mxu1 %v1222_v9 }
 0x13d   :  { %974 = vmatpush3.bf16.msra.mxu0 %v973_v6 }
 0x13e   :  { %975 = vmatprep.subr.bf16.mxu0 %v1222_v9 }
 0x13f   :  { %998 = vmatpush3.bf16.msra.mxu1 %v997_v33 }
 0x140   :  { %999 = vmatprep.subr.bf16.mxu1 %v1222_v9 }
 0x141   :  { %977 = vmatpush3.bf16.msra.mxu0 %v976_v29 }
 0x142   :  { %978 = vmatprep.subr.bf16.mxu0 %v1222_v9 }
 0x143   :  { %1001 = vmatpush3.bf16.msra.mxu1 %v1000_v37 }
 0x144   :  { %1002 = vmatprep.subr.bf16.mxu1 %v1222_v9 }
 0x145   :  { %980 = vmatpush3.bf16.msra.mxu0 %v979_v13 }
 0x146   :  { %981 = vmatprep.subr.bf16.mxu0 %v1222_v9 }
 0x147   :  { %v393_v19 = vpop.f32.mrb[0].mxu1  ;;  %1004 = vmatpush3.bf16.msra.mxu1 %v1003_v40 }
 0x148   :  { %v873_v20 = vpop.f32.mrb[1].mxu1  ;;  %1005 = vmatprep.subr.bf16.mxu1 %v1222_v9 }
 0x149   :  { %983 = vmatpush3.bf16.msra.mxu0 %v982_v16 }
 0x14a   :  { %984 = vmatprep.subr.bf16.mxu0 %v1222_v9 }
 0x14b   :  { %1007 = vmatpush3.bf16.msra.mxu1 %v1006_v43 }
 0x14c   :  { %1008 = vmatprep.subr.bf16.mxu1 %v1222_v9 }
 0x14d   :  { %986 = vmatpush3.bf16.msra.mxu0 %v985_v8 }
 0x14e   :  { %987 = vmatprep.subr.bf16.mxu0 %v1222_v9 }
 0x14f   :  { %1010 = vmatpush3.bf16.msra.mxu1 %v1009_v46 }
 0x150   :  { %1011 = vmatprep.subr.bf16.mxu1 %v1222_v9 }
 0x151   :  { %989 = vmatpush3.bf16.msra.mxu0 %v988_v23 }
 0x152   :  { %990 = vmatprep.subr.bf16.mxu0 %v1222_v9 }
 0x153   :  { %1013 = vmatpush3.bf16.msra.mxu1 %v1012_v49 }
 0x154   :  { %1014 = vmatprep.subr.bf16.mxu1 %v1222_v9  ;;  %v806_v9 = vld [vmem:[%s1451_s6] ss:$0 sm:$0xff] }
 0x155   :  { %992 = vmatpush3.bf16.msra.mxu0 %v991_v26 }
 0x157   :  { %1016 = vmatpush3.bf16.msra.mxu1 %v1015_v60 }
 0x20b   :  { %v320_v50 = vpop.f32.mrb[0].mxu0  ;;  %v574_v51 = vpop.f32.mrb[2].mxu1 }
 0x20c   :  { %v394_v52 = vadd.f32 %v393_v19, %v320_v50  ;;  %v868_v53 = vpop.f32.mrb[1].mxu0  ;;  %v886_v54 = vpop.f32.mrb[3].mxu1 }
 0x20e   :  { %v578_v56 = vadd.f32 %v574_v51, %v394_v52 }
 0x210   :  { %v586_v57 = vadd.f32 %v805_v55, %v578_v56 }
 0x212   :  { %v587_v58 = vmax.f32 %v586_v57, 0.0 }
 0x214   :  { %920 = vmatmul.mubr.f32.vlgmr.msra.gmra.mrb[2].mxu0 %v587_v58 }
 0x2e7   :  { %v677_v61 = vpop.f32.mrb[2].mxu0 }
 0x2e8   :  { %v678_v62 = vadd.f32 %v806_v9, %v677_v61  ;;  %v921_v63 = vpop.f32.mrb[3].mxu0 }
 0x2ea   :  { %v681_v0 = vmax.f32 %v678_v62, 0.0 }
 0x2ec   :  { %955 = vmatmul.mubr.f32.vlgmr.msra.gmra.mrb[4].mxu1 %v681_v0 }
 0x3bf   :  { %v771_v2 = vpop.f32.mrb[4].mxu1 }
 0x3c0   :  { %v772_v3 = vadd.f32 %v807_v1, %v771_v2  ;;  %v956_v4 = vpop.f32.mrb[5].mxu1 }
 0x3c2   :  { %775 = vst [vmem:[#allocation13] sm:$0xff] %v772_v3 }
 0x3c3   :  { %1189 = shalt.err (!%p1186_p10)
}
 0x3c4   :  { %s1190_s22 = scalar_lea.hbm %s1454_s9, 128 }
 0x3c5   :  { %p1191_p11 = scmp.ne.s32.totalorder %s1454_s9, %s1190_s22  ;;  %p1194_p12 = scmp.lt.u32.totalorder %s1190_s22, %s1454_s9 }
 0x3c7   :  { %p1196_p13 = pnand %p1194_p12, %p1191_p11 }
 0x3c9   :  { %1199 = shalt.err (!%p1196_p13)
}
 0x3ca   :  { %785 = dma.vmem_to_hbm [thread:$0]  %s783_s21, 128, %s1454_s9, [#allocation4]  }
 0x3cb   :  { %1208 = dma.done.wait [#allocation4], 128  }
 0x3cc   :  { %1209 = vsyncadd [#allocation4], 4294967168 }
 0x3cd   :  { %789 = vsyncpa [#allocation3], 1 }
 0x3ce   :  { %790 = vsyncpa [#allocation6], 1 }
 0x3cf   :  { %791 = vsyncpa [#allocation9], 1 }
 0x3d0   :  { %792 = vsyncpa [#allocation12], 1 }
 0x3d1   :  { %793 = vsyncpa [#allocation4], 1 }

</bundles_post_ra>
